<compile_context>
chip_gen: v7x
topology: tpu7x:2x2x1
jax: 0.10.0
libtpu: 0.0.40
codegen_flags: <defaults>
</compile_context>

<pallas_src>
import jax
import jax.numpy as jnp
from jax.experimental import pallas as pl
from jax.experimental.pallas import tpu as pltpu

_LOG2_F32 = 0.6931471805599453
_BIG_THRESH = 1e18    # above this, x*x would overflow f32; use log(2) + log(|x|)
_TINY_THRESH = 1e-4   # below this, asinh(x) == x to f32 precision


def _asinh_kernel(x_ref, o_ref):
    x = x_ref[...].astype(jnp.float32)
    ax = jnp.abs(x)

    # Mid range: classic formula log(|x| + sqrt(x^2 + 1)).
    mid = jnp.log(ax + jnp.sqrt(ax * ax + 1.0))
    # Large |x|: asinh(x) ~ log(2|x|)  (avoids x*x -> inf).
    big = jnp.float32(_LOG2_F32) + jnp.log(ax)
    y = jnp.where(ax > _BIG_THRESH, big, mid)
    # Tiny |x|: asinh(x) == x within f32 precision (also avoids log(1+eps) loss).
    y = jnp.where(ax < _TINY_THRESH, ax, y)

    # Exact sign transfer from x (preserves -0.0, unlike where(x < 0, -y, y)).
    sign = pltpu.bitcast(x, jnp.uint32) & jnp.uint32(0x80000000)
    y = pltpu.bitcast(pltpu.bitcast(y, jnp.uint32) | sign, jnp.float32)

    o_ref[...] = y.astype(o_ref.dtype)


def asinh_pallas(x):
    orig_shape = x.shape
    # torch.asinh promotes integer inputs to floating point.
    if not jnp.issubdtype(x.dtype, jnp.floating):
        x = x.astype(jnp.float32)
    dtype = x.dtype
    n = x.size
    if n == 0:
        return x

    # Widest lane-dense slab that divides n exactly (no pad in the common case).
    lane = None
    for w in (1024, 512, 256, 128):
        if n % w == 0:
            lane = w
            break
    xf = jnp.ravel(x)
    if lane is None:
        lane = 128
        n_pad = ((n + lane - 1) // lane) * lane
        xf = jnp.pad(xf, (0, n_pad - n))
    else:
        n_pad = n
    rows = n_pad // lane
    x2d = xf.reshape(rows, lane)

    # ~2 MiB blocks in the I/O dtype: big enough to hit HBM roofline, small
    # enough for v5e's 16 MiB scoped VMEM with in+out double-buffered.
    itemsize = jnp.dtype(dtype).itemsize
    target_block_bytes = 2 * 1024 * 1024
    rows_per_block = max(1, target_block_bytes // (lane * itemsize))
    if rows_per_block >= rows:
        tile_r = rows                       # single full-height block
    else:
        tile_r = max(8, (rows_per_block // 8) * 8)  # keep (8,128) alignment

    grid = (pl.cdiv(rows, tile_r),)

    out2d = pl.pallas_call(
        _asinh_kernel,
        out_shape=jax.ShapeDtypeStruct((rows, lane), dtype),
        grid=grid,
        in_specs=[pl.BlockSpec((tile_r, lane), lambda i: (i, 0))],
        out_specs=pl.BlockSpec((tile_r, lane), lambda i: (i, 0)),
        input_output_aliases={0: 0},
        compiler_params=pltpu.CompilerParams(
            dimension_semantics=("parallel",),
        ),
    )(x2d)

    out = out2d.reshape(-1)
    if n_pad != n:
        out = out[:n]
    return out.reshape(orig_shape)


if __name__ == "__main__":
    key = jax.random.PRNGKey(0)
    # Small NCHW input consistent with a generic forward: [B=2, C=4, H=16, W=16]
    x = jax.random.normal(key, (2, 4, 16, 16), dtype=jnp.float32) * 3.0

    y = jax.block_until_ready(asinh_pallas(x))
    y_ref = jnp.arcsinh(x)
    assert y.shape == x.shape and y.dtype == x.dtype
    assert jnp.allclose(y, y_ref, atol=1e-5, rtol=1e-5), "mismatch vs reference"

    # Extreme-value / ragged-size check (exercises big/tiny branches and the
    # misaligned padding path).
    x2 = jnp.array([0.0, -0.0, 1e-8, -1e-8, 1e20, -1e20, 3.5, -3.5],
                   dtype=jnp.float32).reshape(2, 4)
    y2 = jax.block_until_ready(asinh_pallas(x2))
    assert jnp.allclose(y2, jnp.arcsinh(x2), atol=1e-5, rtol=1e-5), \
        "mismatch vs reference (extremes)"

    print("KERNEL_OK")
</pallas_src>

<mosaic_0001>
module attributes {stable_mosaic.version = 11 : i64} {
  func.func @_asinh_kernel(%arg0: i32, %arg1: memref<2x1024xf32, #tpu.memory_space<vmem>>, %arg2: memref<2x1024xf32, #tpu.memory_space<vmem>>) attributes {dimension_semantics = [#tpu.dimension_semantics<parallel>], iteration_bounds = array<i64: 1>, scalar_prefetch = 0 : i64, scratch_operands = 0 : i64, tpu.core_type = #tpu.core_type<tc>, window_params = [{transform_indices = @transform_0, window_bounds = array<i64: 2, 1024>}, {transform_indices = @transform_1, window_bounds = array<i64: 2, 1024>}]} {
    %c0 = arith.constant 0 : index
    %c0_0 = arith.constant 0 : index
    %0 = vector.load %arg1[%c0, %c0_0] : memref<2x1024xf32, #tpu.memory_space<vmem>>, vector<2x1024xf32>
    %1 = math.absf %0 : vector<2x1024xf32>
    %2 = arith.mulf %1, %1 : vector<2x1024xf32>
    %cst = arith.constant 1.000000e+00 : f32
    %3 = vector.broadcast %cst : f32 to vector<2x1024xf32>
    %4 = arith.addf %2, %3 : vector<2x1024xf32>
    %5 = math.sqrt %4 : vector<2x1024xf32>
    %6 = arith.addf %1, %5 : vector<2x1024xf32>
    %7 = math.log %6 : vector<2x1024xf32>
    %8 = math.log %1 : vector<2x1024xf32>
    %cst_1 = arith.constant 0.693147182 : f32
    %9 = vector.broadcast %cst_1 : f32 to vector<2x1024xf32>
    %10 = arith.addf %9, %8 : vector<2x1024xf32>
    %cst_2 = arith.constant 9.99999984E+17 : f32
    %11 = vector.broadcast %cst_2 : f32 to vector<2x1024xf32>
    %12 = arith.cmpf ogt, %1, %11 : vector<2x1024xf32>
    %13 = arith.select %12, %10, %7 : vector<2x1024xi1>, vector<2x1024xf32>
    %cst_3 = arith.constant 9.99999974E-5 : f32
    %14 = vector.broadcast %cst_3 : f32 to vector<2x1024xf32>
    %15 = arith.cmpf olt, %1, %14 : vector<2x1024xf32>
    %16 = arith.select %15, %1, %13 : vector<2x1024xi1>, vector<2x1024xf32>
    %17 = tpu.bitcast %0 : vector<2x1024xf32> -> vector<2x1024xi32>
    %c-2147483648_i32 = arith.constant -2147483648 : i32
    %18 = vector.broadcast %c-2147483648_i32 : i32 to vector<2x1024xi32>
    %19 = arith.andi %17, %18 : vector<2x1024xi32>
    %20 = tpu.bitcast %16 : vector<2x1024xf32> -> vector<2x1024xi32>
    %21 = arith.ori %20, %19 : vector<2x1024xi32>
    %22 = tpu.bitcast %21 : vector<2x1024xi32> -> vector<2x1024xf32>
    %c0_4 = arith.constant 0 : index
    %c0_5 = arith.constant 0 : index
    %23 = vector.load %arg2[%c0_4, %c0_5] : memref<2x1024xf32, #tpu.memory_space<vmem>>, vector<2x1024xf32>
    tpu.vector_store %arg2[%c0_4, %c0_5], %22 {strides = array<i32>} : memref<2x1024xf32, #tpu.memory_space<vmem>>, vector<2x1024xf32>,
    return
  }
  func.func @transform_0(%arg0: i32) -> (i32, i32) {
    %c0_i32 = arith.constant 0 : i32
    %c0_i32_0 = arith.constant 0 : i32
    return %arg0, %c0_i32 : i32, i32
  }
  func.func @transform_1(%arg0: i32) -> (i32, i32) {
    %c0_i32 = arith.constant 0 : i32
    %c0_i32_0 = arith.constant 0 : i32
    return %arg0, %c0_i32 : i32, i32
  }
}

</mosaic_0001>

<bundles_post_ra>
// kernel: tpu_custom_call.1
= control target key start
LH: loop header
LB: loop body
LE: loop exit
PB: predicated region body
PF: predicated region fallthrough
CT: control target
= control target key end

     0   :  { %6 = vsyncpa [#allocation3], 0  ;;  %s329_s0 = inlined_call_operand.hbm [shape: f32[2,1024], index: 0, kind: input, shape index: {}, may-alias: {0,1}]   ;;  %s330_s1 = inlined_call_operand.hbm [shape: f32[2,1024], index: 1, kind: output, shape index: {}, may-alias: {0,1}]  }
   0x1   :  { %7 = vsyncpa [#allocation4], 0  ;;  %s269_s6 = smov [#allocation2]   ;;  %s221_s10 = scalar_lea.hbm %s329_s0, 256 }
   0x2   :  { %s14_s7 = sshll.u32 %s269_s6, 4  ;;  %p222_p0 = scmp.ne.s32.totalorder %s329_s0, %s221_s10  ;;  %s15_s7 = int_to_ptr.vmem [resolvable:$true] %s14_s7 }
   0x3   :  { %p225_p1 = scmp.lt.u32.totalorder %s221_s10, %s329_s0 }
   0x5   :  { %p227_p2 = pnand %p225_p1, %p222_p0 }
   0x7   :  { %230 = shalt.err (!%p227_p2)
}
   0x8   :  { %s231_s15 = scalar_lea.vmem %s15_s7, 256  ;;  %p236_p4 = scmp.lt.s32.totalorder %s15_s7, %s15_s7 }
   0x9   :  { %p232_p3 = scmp.ne.s32.totalorder %s15_s7, %s231_s15  ;;  %p237_p5 = scmp.lt.s32.totalorder %s231_s15, %s231_s15 }
   0xb   :  { %p238_p6 = por %p237_p5, %p236_p4 }
   0xd   :  { %p239_p7 = pnand %p238_p6, %p232_p3 }
   0xf   :  { %242 = shalt.err (!%p239_p7)
}
  0x10   :  { %17 = dma.hbm_to_vmem [thread:$0]  %s329_s0, 256, %s15_s7, [#allocation3]  }
  0x11   :  { %265 = dma.done.wait [#allocation3], 256  }
  0x12   :  { %266 = vsyncadd [#allocation3], 4294967040  ;;  %v21_v0 = vld [vmem:[#allocation2] sm:$0xff]  ;;  %v22_v1 = vld [vmem:[#allocation2 + $0x8] sm:$0xff]  ;;  %v69_v8 = vlaneseq  ;;  %v270_v11 = vmov 1983009808  }
  0x13   :  { %v23_v2 = vand.u32 2147483647, %v21_v0  ;;  %v294_v3 = vand.u32 2147483647, %v22_v1  ;;  %v67_v12 = vunpack.c.l.s4 %v270_v11  ;;  %v65_v29 = vcombine.high %v21_v0, %v21_v0  ;;  %s271_s0 = smov [#allocation5]  }
  0x14   :  { %v70_v20 = vshrl.u32 %v69_v8, 7  ;;  %v82_v32 = vcombine.high %v22_v1, %v22_v1  ;;  %s195_s18 = sshll.u32 %s271_s0, 4  ;;  %s196_s18 = int_to_ptr.vmem [resolvable:$true] %s195_s18 }
  0x15   :  { %v25_v4 = vmul.f32 %v23_v2, %v23_v2  ;;  %v26_v5 = vmul.f32 %v294_v3, %v294_v3  ;;  %v68_v19 = vunpack.c.0.s8 %v67_v12  ;;  %vm55_vm4 = vcmp.gt.f32.partialorder %v23_v2, 1e+18  ;;  %s243_s19 = scalar_lea.vmem %s196_s18, 256  ;;  %p248_p9 = scmp.lt.s32.totalorder %s196_s18, %s196_s18 }
  0x16   :  { %vm59_vm5 = vcmp.lt.f32.partialorder %v23_v2, 0.0001  ;;  %vm56_vm6 = vcmp.gt.f32.partialorder %v294_v3, 1e+18  ;;  %vm60_vm7 = vcmp.lt.f32.partialorder %v294_v3, 0.0001  ;;  %p244_p8 = scmp.ne.s32.totalorder %s196_s18, %s243_s19  ;;  %p249_p10 = scmp.lt.s32.totalorder %s243_s19, %s243_s19 }
  0x17   :  { %v27_v6 = vadd.f32 1.0, %v25_v4  ;;  %v28_v7 = vadd.f32 1.0, %v26_v5  ;;  %v300_v25 = vsub.s32 %v68_v19, %v70_v20 }
  0x18   :  { %p250_p11 = por %p249_p10, %p248_p9 }
  0x19   :  { %209 = vrsqrt.f32 %v27_v6  ;;  %vm31_vm0 = vcmp.eq.f32.partialorder %v27_v6, inf  ;;  %v34_v10 = vand.u32 2147483648, %v27_v6  ;;  %vm33_vm1 = vcmp.eq.f32.partialorder %v27_v6, 0.0 }
  0x1a   :  { %211 = vrsqrt.f32 %v28_v7  ;;  %vm38_vm2 = vcmp.eq.f32.partialorder %v28_v7, inf  ;;  %v41_v15 = vand.u32 2147483648, %v28_v7  ;;  %vm40_vm3 = vcmp.eq.f32.partialorder %v28_v7, 0.0  ;;  %p251_p12 = pnand %p250_p11, %p244_p8 }
  0x1b   :  { %213 = vlog2.f32 %v23_v2  ;;  %v72_v30 = vrot.slane %v21_v0, %v300_v25  ;;  %v89_v33 = vrot.slane %v22_v1, %v300_v25  ;;  %v79_v35 = vrot.slane %v65_v29, %v300_v25 }
  0x1c   :  { %215 = vlog2.f32 %v294_v3  ;;  %v96_v39 = vrot.slane %v82_v32, %v300_v25 }
  0x1d   :  { %v80_v36 = vcombine.high %v72_v30, %v72_v30  ;;  %v97_v43 = vcombine.high %v89_v33, %v89_v33  ;;  %v81_v45 = vcombine.high %v79_v35, %v79_v35  ;;  %v99_v46 = vand.u32 2147483648, %v72_v30 }
  0x1e   :  { %v98_v50 = vcombine.high %v96_v39, %v96_v39  ;;  %v103_v51 = vand.u32 2147483648, %v89_v33  ;;  %v101_v52 = vand.u32 2147483648, %v79_v35  ;;  %v105_v57 = vand.u32 2147483648, %v96_v39 }
  0x1f   :  { %v100_v47 = vand.u32 2147483648, %v80_v36  ;;  %v104_v56 = vand.u32 2147483648, %v97_v43  ;;  %v102_v60 = vand.u32 2147483648, %v81_v45 }
  0x20   :  { %v106_v0 = vand.u32 2147483648, %v98_v50 }
  0x23   :  { %v210_v9 = vpop.eup %209 }
  0x24   :  { %v212_v13 = vpop.eup %211  ;;  %v30_v14 = vmul.f32 %v210_v9, %v27_v6 }
  0x25   :  { %v37_v16 = vmul.f32 %v212_v13, %v28_v7  ;;  %v214_v26 = vpop.eup %213 }
  0x26   :  { %v32_v17 = vsel %vm31_vm0, %v27_v6, %v30_v14  ;;  %v216_v27 = vpop.eup %215  ;;  %v50_v28 = vmul.f32 0.6931472, %v214_v26 }
  0x27   :  { %v35_v18 = vsel %vm33_vm1, %v34_v10, %v32_v17  ;;  %v39_v21 = vsel %vm38_vm2, %v28_v7, %v37_v16  ;;  %v52_v31 = vmul.f32 0.6931472, %v216_v27 }
  0x28   :  { %v43_v22 = vadd.f32 %v35_v18, %v23_v2  ;;  %v42_v23 = vsel %vm40_vm3, %v41_v15, %v39_v21  ;;  %v53_v34 = vadd.f32 0.6931472, %v50_v28 }
  0x29   :  { %v44_v24 = vadd.f32 %v42_v23, %v294_v3  ;;  %v54_v38 = vadd.f32 0.6931472, %v52_v31 }
  0x2a   :  { %217 = vlog2.f32 %v43_v22 }
  0x2b   :  { %219 = vlog2.f32 %v44_v24 }
  0x34   :  { %v218_v37 = vpop.eup %217 }
  0x35   :  { %v220_v40 = vpop.eup %219  ;;  %v46_v41 = vmul.f32 0.6931472, %v218_v37 }
  0x36   :  { %v48_v42 = vmul.f32 0.6931472, %v220_v40 }
  0x37   :  { %v57_v44 = vsel %vm55_vm4, %v53_v34, %v46_v41 }
  0x38   :  { %v61_v48 = vsel %vm59_vm5, %v23_v2, %v57_v44  ;;  %v58_v49 = vsel %vm56_vm6, %v54_v38, %v48_v42 }
  0x39   :  { %v109_v53 = vcombine.high %v61_v48, %v61_v48  ;;  %v116_v54 = vrot.slane %v61_v48, %v300_v25  ;;  %v62_v55 = vsel %vm60_vm7, %v294_v3, %v58_v49 }
  0x3a   :  { %v126_v58 = vcombine.high %v62_v55, %v62_v55  ;;  %v133_v59 = vrot.slane %v62_v55, %v300_v25 }
  0x3b   :  { %v123_v61 = vrot.slane %v109_v53, %v300_v25  ;;  %v124_v62 = vcombine.high %v116_v54, %v116_v54  ;;  %v143_v63 = vor.u32 %v116_v54, %v99_v46 }
  0x3c   :  { %v140_v1 = vrot.slane %v126_v58, %v300_v25  ;;  %v141_v2 = vcombine.high %v133_v59, %v133_v59  ;;  %v147_v4 = vor.u32 %v133_v59, %v103_v51 }
  0x3d   :  { %v125_v5 = vcombine.high %v123_v61, %v123_v61  ;;  %v144_v6 = vor.u32 %v124_v62, %v100_v47  ;;  %v145_v7 = vor.u32 %v123_v61, %v101_v52 }
  0x3e   :  { %v142_v8 = vcombine.high %v140_v1, %v140_v1  ;;  %v148_v3 = vor.u32 %v141_v2, %v104_v56  ;;  %v149_v9 = vor.u32 %v140_v1, %v105_v57 }
  0x3f   :  { %v146_v10 = vor.u32 %v125_v5, %v102_v60  ;;  %v151_v11 = vcombine.low %v143_v63, %v144_v6 }
  0x40   :  { %v150_v12 = vor.u32 %v142_v8, %v106_v0  ;;  %v168_v13 = vcombine.low %v147_v4, %v148_v3 }
  0x41   :  { %v152_v14 = vcombine.low %v145_v7, %v146_v10  ;;  %v159_v15 = vrot.slane %v151_v11, %v300_v25 }
  0x42   :  { %v169_v16 = vcombine.low %v149_v9, %v150_v12  ;;  %v176_v17 = vrot.slane %v168_v13, %v300_v25 }
  0x43   :  { %v166_v18 = vrot.slane %v152_v14, %v300_v25 }
  0x44   :  { %v183_v19 = vrot.slane %v169_v16, %v300_v25 }
  0x45   :  { %v167_v20 = vcombine.low %v159_v15, %v166_v18 }
  0x46   :  { %v184_v21 = vcombine.low %v176_v17, %v183_v19 }
  0x47   :  { %187 = vst [vmem:[#allocation5] sm:$0xff] %v167_v20 }
  0x48   :  { %188 = vst [vmem:[#allocation5 + $0x8] sm:$0xff] %v184_v21 }
  0x49   :  { %254 = shalt.err (!%p251_p12)
}
  0x4a   :  { %s255_s22 = scalar_lea.hbm %s330_s1, 256 }
  0x4b   :  { %p256_p13 = scmp.ne.s32.totalorder %s330_s1, %s255_s22  ;;  %p259_p0 = scmp.lt.u32.totalorder %s255_s22, %s330_s1 }
  0x4d   :  { %p261_p1 = pnand %p259_p0, %p256_p13 }
  0x4f   :  { %264 = shalt.err (!%p261_p1)
}
  0x50   :  { %198 = dma.vmem_to_hbm [thread:$0]  %s196_s18, 256, %s330_s1, [#allocation4]  }
  0x51   :  { %267 = dma.done.wait [#allocation4], 256  }
  0x52   :  { %268 = vsyncadd [#allocation4], 4294967040 }
  0x53   :  { %202 = vsyncpa [#allocation3], 1 }
  0x54   :  { %203 = vsyncpa [#allocation4], 1 }

</bundles_post_ra>
